<compile_context>
chip_gen: v6e
topology: v6e:2x2x1
jax: 0.10.0
libtpu: 0.0.40
codegen_flags: <defaults>
</compile_context>

<pallas_src>
import jax
import jax.numpy as jnp
from jax import lax
from jax.experimental import pallas as pl
from jax.experimental.pallas import tpu as pltpu


_LANE = 128
_SUBLANE = 8
_N_SEMS = 8                       # power of two; DMA sems for the row-DMA path
_DEFAULT_BLOCK_B = 256            # ids gathered per grid step
_RESIDENT_TABLE_BYTES = 4 * 1024 * 1024   # tables up to this stay fully in VMEM


def _round_up(x: int, m: int) -> int:
    return (x + m - 1) // m * m


# -----------------------------------------------------------------------------
# Kernel 1: whole table resident in VMEM; gather rows with dynamic sublane
# slices; one (B, h_pad) lane-dense block written per grid step.
# -----------------------------------------------------------------------------
def _resident_gather_kernel(ids_ref, table_ref, out_ref):
    chunk = pl.program_id(0)
    block_b = out_ref.shape[0]
    base = chunk * block_b

    def body(r, carry):
        idx = ids_ref[base + r]                                 # scalar (SMEM)
        out_ref[pl.ds(r, 1), :] = table_ref[pl.ds(idx, 1), :]   # VMEM -> VMEM
        return carry

    lax.fori_loop(0, block_b, body, 0)


# -----------------------------------------------------------------------------
# Kernel 2: table stays in HBM; B overlapped per-row DMAs per grid step into a
# VMEM scratch, single lane-dense slab writeback.
# -----------------------------------------------------------------------------
def _rowdma_gather_kernel(ids_ref, table_hbm, out_ref, buf, sems):
    chunk = pl.program_id(0)
    block_b = out_ref.shape[0]
    base = chunk * block_b

    def issue(r, carry):
        idx = ids_ref[base + r]
        pltpu.make_async_copy(
            table_hbm.at[pl.ds(idx, 1), :],
            buf.at[pl.ds(r, 1), :],
            sems.at[r & (_N_SEMS - 1)],
        ).start()
        return carry

    def drain(r, carry):
        idx = ids_ref[base + r]
        pltpu.make_async_copy(
            table_hbm.at[pl.ds(idx, 1), :],
            buf.at[pl.ds(r, 1), :],
            sems.at[r & (_N_SEMS - 1)],
        ).wait()
        return carry

    lax.fori_loop(0, block_b, issue, 0)   # put all B row fetches in flight
    lax.fori_loop(0, block_b, drain, 0)   # wait for all of them
    out_ref[...] = buf[...]               # one lane-dense (B, h_pad) store


# -----------------------------------------------------------------------------
# Wrapper
# -----------------------------------------------------------------------------
def embedding_lookup(table: jax.Array, node_ids: jax.Array, *,
                     block_b: int = _DEFAULT_BLOCK_B,
                     force_row_dma: bool = False) -> jax.Array:
    """out[i] = table[node_ids[i]]  (torch.nn.Embedding forward semantics)."""
    num_nodes, h_dim = table.shape
    n = int(node_ids.shape[0])

    # 1-D int32 ids for SMEM scalar prefetch (avoids 2-D SMEM padding blowup).
    # TODO(synk): torch.nn.Embedding raises on out-of-range ids; we clamp so a
    # bad id can never drive a DMA / dynamic slice outside the table.
    ids = jnp.clip(node_ids.reshape(-1).astype(jnp.int32), 0, num_nodes - 1)

    # Lane-dense layout: pad hidden dim to a multiple of 128.
    h_pad = _round_up(h_dim, _LANE)
    table_p = table if h_pad == h_dim else jnp.pad(
        table, ((0, 0), (0, h_pad - h_dim)))

    # Batch B ids per grid step; pad the id vector to a multiple of B.
    b = min(block_b, _round_up(n, _SUBLANE))
    n_pad = _round_up(n, b)
    if n_pad != n:
        ids = jnp.pad(ids, (0, n_pad - n))
    num_chunks = n_pad // b

    table_bytes = num_nodes * h_pad * table_p.dtype.itemsize
    use_resident = (not force_row_dma) and table_bytes <= _RESIDENT_TABLE_BYTES

    if use_resident:
        grid_spec = pltpu.PrefetchScalarGridSpec(
            num_scalar_prefetch=1,
            grid=(num_chunks,),
            in_specs=[
                # Whole table as one VMEM block; constant block index -> it is
                # fetched once and stays resident across all chunks.
                pl.BlockSpec((num_nodes, h_pad), lambda i, ids: (0, 0)),
            ],
            out_specs=pl.BlockSpec((b, h_pad), lambda i, ids: (i, 0)),
        )
        kernel = _resident_gather_kernel
        dim_sem = ("parallel",)     # chunks independent -> v7x 2-TC sharding
    else:
        grid_spec = pltpu.PrefetchScalarGridSpec(
            num_scalar_prefetch=1,
            grid=(num_chunks,),
            in_specs=[pl.BlockSpec(memory_space=pl.ANY)],   # table stays in HBM
            out_specs=pl.BlockSpec((b, h_pad), lambda i, ids: (i, 0)),
            scratch_shapes=[
                pltpu.VMEM((b, h_pad), table_p.dtype),
                pltpu.SemaphoreType.DMA((_N_SEMS,)),
            ],
        )
        kernel = _rowdma_gather_kernel
        dim_sem = ("arbitrary",)    # manual DMA/semaphore path: keep serial

    out_p = pl.pallas_call(
        kernel,
        grid_spec=grid_spec,
        out_shape=jax.ShapeDtypeStruct((n_pad, h_pad), table_p.dtype),
        compiler_params=pltpu.CompilerParams(
            dimension_semantics=dim_sem,
            vmem_limit_bytes=32 * 1024 * 1024,   # fits v7x's smaller VMEM too
        ),
    )(ids, table_p)

    return out_p[:n, :h_dim]


class EmbeddingLayer:
    """JAX/Pallas port of the PyTorch EmbeddingLayer (nn.Embedding wrapper)."""

    def __init__(self, num_nodes: int, h_dim: int, key: jax.Array):
        # torch.nn.Embedding default init: weight ~ N(0, 1), float32.
        self.weight = jax.random.normal(key, (num_nodes, h_dim), dtype=jnp.float32)

    def forward(self, node_id: jax.Array) -> jax.Array:
        # Original module writes g.ndata['h']; here we return h directly.
        node_id = jnp.reshape(node_id, (-1,))
        return embedding_lookup(self.weight, node_id)


if __name__ == "__main__":
    key = jax.random.PRNGKey(0)
    k_w, k_ids = jax.random.split(key)

    num_nodes = 64   # size of the lookup table
    h_dim = 32       # embedding width
    n_sampled = 16   # number of sampled nodes in the subgraph

    layer = EmbeddingLayer(num_nodes, h_dim, k_w)

    # g.ndata['id'] is typically shape (n, 1); .squeeze() flattens it.
    node_id = jax.random.randint(k_ids, (n_sampled, 1), 0, num_nodes,
                                 dtype=jnp.int32)

    # Resident-table path (table fits VMEM).
    h = layer.forward(node_id)
    h = jax.block_until_ready(h)

    ref = layer.weight[jnp.squeeze(node_id)]
    assert h.shape == (n_sampled, h_dim)
    assert jnp.array_equal(h, ref), "Pallas resident-table gather mismatch"

    # Also exercise the large-table (HBM row-DMA) path on the same data.
    h2 = embedding_lookup(layer.weight, jnp.squeeze(node_id),
                          force_row_dma=True)
    h2 = jax.block_until_ready(h2)
    assert jnp.array_equal(h2, ref), "Pallas row-DMA gather mismatch"

    print("KERNEL_OK")
</pallas_src>

<mosaic_0001>
module attributes {stable_mosaic.version = 11 : i64} {
  func.func @_resident_gather_kernel(%arg0: i32, %arg1: memref<16xi32, #tpu.memory_space<smem>>, %arg2: memref<64x128xf32, #tpu.memory_space<vmem>>, %arg3: memref<16x128xf32, #tpu.memory_space<vmem>>) attributes {dimension_semantics = [#tpu.dimension_semantics<parallel>], iteration_bounds = array<i64: 1>, scalar_prefetch = 1 : i64, scratch_operands = 0 : i64, tpu.core_type = #tpu.core_type<tc>, window_params = [{pipeline_mode = #tpu.pipeline_mode<synchronous>, transform_indices = @transform_0, window_bounds = array<i64: 64, 128>}, {transform_indices = @transform_1, window_bounds = array<i64: 16, 128>}]} {
    %c16_i32 = arith.constant 16 : i32
    %0 = arith.muli %arg0, %c16_i32 : i32
    %c0_i32 = arith.constant 0 : i32
    %c16_i32_0 = arith.constant 16 : i32
    %1 = arith.addi %c0_i32, %c16_i32_0 : i32
    %c1_i32 = arith.constant 1 : i32
    scf.for %arg4 = %c0_i32 to %1 step %c1_i32  : i32 {
      %2 = arith.addi %0, %arg4 : i32
      %3 = arith.index_cast %2 : i32 to index
      %4 = memref.load %arg1[%3] : memref<16xi32, #tpu.memory_space<smem>>
      %5 = arith.index_cast %4 : i32 to index
      %c0 = arith.constant 0 : index
      %6 = vector.load %arg2[%5, %c0] : memref<64x128xf32, #tpu.memory_space<vmem>>, vector<1x128xf32>
      %7 = arith.index_cast %arg4 : i32 to index
      %c0_2 = arith.constant 0 : index
      %8 = vector.load %arg3[%7, %c0_2] : memref<16x128xf32, #tpu.memory_space<vmem>>, vector<1x128xf32>
      tpu.vector_store %arg3[%7, %c0_2], %6 {strides = array<i32>} : memref<16x128xf32, #tpu.memory_space<vmem>>, vector<1x128xf32>,
    }
    %c16_i32_1 = arith.constant 16 : i32
    return
  }
  func.func @transform_0(%arg0: i32, %arg1: memref<16xi32, #tpu.memory_space<smem>>) -> (i32, i32) {
    %c0_i32 = arith.constant 0 : i32
    %c0_i32_0 = arith.constant 0 : i32
    %c0_i32_1 = arith.constant 0 : i32
    return %c0_i32, %c0_i32_0 : i32, i32
  }
  func.func @transform_1(%arg0: i32, %arg1: memref<16xi32, #tpu.memory_space<smem>>) -> (i32, i32) {
    %c0_i32 = arith.constant 0 : i32
    %c0_i32_0 = arith.constant 0 : i32
    return %arg0, %c0_i32 : i32, i32
  }
}

</mosaic_0001>

<bundles_post_ra>
// kernel: tpu_custom_call.1
= control target key start
LH: loop header
LB: loop body
LE: loop exit
PB: predicated region body
PF: predicated region fallthrough
CT: control target
= control target key end

     0   :  { %s140_s9 = smov [#allocation3]   ;;  %s175_s0 = inlined_call_operand.hbm [shape: s32[16], index: 0, kind: input, shape index: {}]   ;;  %s176_s1 = inlined_call_operand.hbm [shape: f32[64,128], index: 1, kind: input, shape index: {}]   ;;  %s177_s2 = inlined_call_operand.hbm [shape: f32[16,128], index: 2, kind: output, shape index: {}]  }
   0x1   :  { %8 = dma.hbm_to_smem %s175_s0, 16, %s140_s9, [#allocation2] }
   0x2   :  { %130 = dma.done.wait [#allocation2], 16 }
   0x3   :  { %131 = vsyncadd [#allocation2], 4294967280 }
   0x4   :  { %10 = sfence }
   0x5   :  { %11 = vsyncpa [#allocation5], 0 }
   0x6   :  { %12 = vsyncpa [#allocation6], 0  ;;  %s141_s12 = smov [#allocation4]  }
   0x7   :  { %s18_s13 = sshll.u32 %s141_s12, 4  ;;  %s19_s13 = int_to_ptr.vmem [resolvable:$true] %s18_s13 }
   0x8   :  { %s94_s14 = scalar_lea.vmem %s19_s13, 1024  ;;  %p99_p1 = scmp.lt.s32.totalorder %s19_s13, %s19_s13 }
   0x9   :  { %p95_p0 = scmp.ne.s32.totalorder %s19_s13, %s94_s14  ;;  %p100_p2 = scmp.lt.s32.totalorder %s94_s14, %s94_s14 }
   0xb   :  { %p101_p3 = por %p100_p2, %p99_p1 }
   0xd   :  { %p102_p4 = pnand %p101_p3, %p95_p0 }
   0xf   :  { %105 = shalt.err (!%p102_p4)
}
  0x10   :  { %s142_s15 = smov 128   ;;  %s143_s16 = smov 8  }
  0x11   :  { %24 = dma.hbm_to_vmem [thread:$0]  %s176_s1, 1024, %s19_s13, [#allocation5], %s142_s15, %s142_s15, %s143_s16  }
  0x12   :  { %132 = dma.done.wait [#allocation5], 1024  }
  0x13   :  { %133 = vsyncadd [#allocation5], 4294966272  ;;  %s136_s18 = smov 0  }
  0x14 LB: > { %s36_s19 = sld [smem:[#allocation3 + %s138_s18]]  ;;  %s39_s21 = scalar_lea.vmem [#allocation7], %s138_s18  ;;  %s138_s18 = sphi %s136_s18, %s34_s18  }
  0x15   : > { %s34_s18 = sadd.s32 1, %s138_s18  }
  0x16   : > { %p31_p5 = scmp.ge.s32.totalorder %s34_s18, 16  }
  0x17   :  { %s144_s22 = smov (%p31_p5), [#allocation7]  }
  0x18   :  { %33 = sbr.rel (!%p31_p5) target bundleno = 20 (0x14), region = 37  ;;  %s46_s23 = sshll.u32 (%p31_p5), %s144_s22, 4  ;;  %s47_s23 = int_to_ptr.vmem [resolvable:$true] %s46_s23 }
  0x19   :  { %s106_s24 = scalar_lea.vmem (%p31_p5), %s47_s23, 256  ;;  %p111_p7 = scmp.lt.s32.totalorder (%p31_p5), %s47_s23, %s47_s23 }
  0x1a   : > { %s37_s20 = scalar_lea.vmem [#allocation4], %s36_s19  ;;  %p107_p6 = scmp.ne.s32.totalorder (%p31_p5), %s47_s23, %s106_s24 }
  0x1b   : > { %v38_v0 = vld [vmem:[%s37_s20] sm:$0x1]  ;;  %p112_p8 = scmp.lt.s32.totalorder (%p31_p5), %s106_s24, %s106_s24 }
  0x1c   : > { %40 = vst [vmem:[%s39_s21] sm:$0x1] %v38_v0 }
  0x1d   :  { %p113_p9 = por %p112_p8, %p111_p7 }
  0x1f   :  { %p114_p10 = pnand %p113_p9, %p107_p6 }
  0x21   :  { %117 = shalt.err (!%p114_p10)
}
  0x22   :  { %52 = dma.vmem_to_hbm [thread:$0]  %s47_s23, 256, %s177_s2, [#allocation6], %s142_s15, %s142_s15, %s143_s16  }
  0x23   :  { %134 = dma.done.wait [#allocation6], 256  }
  0x24   :  { %135 = vsyncadd [#allocation6], 4294967040 }
  0x25   :  { %56 = vsyncpa [#allocation5], 1 }
  0x26   :  { %57 = vsyncpa [#allocation6], 1 }

</bundles_post_ra>
